<compile_context>
chip_gen: v6e
topology: v6e:2x2x1
jax: 0.10.0
libtpu: 0.0.40
codegen_flags: <defaults>
</compile_context>

<pallas_src>
import functools

import jax
import jax.numpy as jnp
from jax.experimental import pallas as pl
from jax.experimental.pallas import tpu as pltpu


IGNORE_INDEX = 255
_TARGET_BLOCK_BYTES = 3 * 1024 * 1024   # ~3 MB of logits per grid step


def _cdiv(a, b):
    return -(-a // b)


def _round_up(x, m):
    return (x + m - 1) // m * m


def _round_down(x, m):
    return x // m * m


def _int_pow(x, n):
    """x ** n for small non-negative integer n via repeated multiplies (VALU only)."""
    if n == 0:
        return jnp.ones_like(x)
    r = x
    for _ in range(n - 1):
        r = r * x
    return r


def _focal_kernel(logits_ref, tgt_ref, out_ref, *, gamma, hw, block_pixels,
                  blocks_per_split, needs_mask):
    # Per-(split, batch-row) accumulator block; resident in VMEM across the
    # spatial ("arbitrary") grid axis.  Zero it on the first spatial step.
    @pl.when(pl.program_id(2) == 0)
    def _():
        out_ref[...] = jnp.zeros_like(out_ref)

    logits = logits_ref[...].astype(jnp.float32)   # (C, ...) pixels dense on sublane+lane
    tgt = tgt_ref[...]                             # (1, ...) int32

    # Numerically stable log-softmax statistics over the (small) channel axis 0.
    # With the (C, tile_s, 128) layout these are pure elementwise VALU passes.
    m = jnp.max(logits, axis=0, keepdims=True)
    shifted = logits - m
    exp_shifted = jnp.exp(shifted)
    sum_exp = jnp.sum(exp_shifted, axis=0, keepdims=True)
    lse = jnp.log(sum_exp)

    # Gather the target-class (shifted) logit with a masked select — no f32
    # one-hot materialization and no extra multiply pass.
    ch = jax.lax.broadcasted_iota(jnp.int32, logits.shape, 0)
    shifted_t = jnp.sum(jnp.where(ch == tgt, shifted, 0.0), axis=0, keepdims=True)

    nll = lse - shifted_t                    # per-pixel cross entropy
    valid = tgt != IGNORE_INDEX
    if needs_mask:
        # Ragged last block / clamped duplicate block: mask positions past the
        # true spatial extent.  jnp.where is a select, so NaN/Inf garbage in the
        # out-of-bounds lanes cannot leak into the accumulator.
        pos = jax.lax.broadcasted_iota(jnp.int32, tgt.shape, tgt.ndim - 1)
        if tgt.ndim == 3:                    # (1, tile_s, 128): rows of 128 lanes
            pos = pos + jax.lax.broadcasted_iota(jnp.int32, tgt.shape, 1) * tgt.shape[-1]
        blk = pl.program_id(0) * blocks_per_split + pl.program_id(2)
        valid = valid & (blk * block_pixels + pos < hw)
    nll = jnp.where(valid, nll, 0.0)         # ignored / OOB rows contribute 0

    # p(target) = exp(-CE): one small (1, tile) EUP exp instead of a (C, tile)
    # multiply + reduce + divide.  Masked rows give p = 1 -> (1-p)^gamma = 0.
    p = jnp.exp(-nll)
    one_minus_p = jnp.maximum(1.0 - p, 0.0)
    if float(gamma) == int(gamma) and gamma >= 0:
        mod = _int_pow(one_minus_p, int(gamma))   # integer gamma: multiplies, no pow
    else:
        # TODO(synk): non-integer gamma falls back to pow (extra EUP transcendentals).
        mod = one_minus_p ** gamma

    out_ref[...] += mod * nll                # lane-dense VPU accumulate


def focal_loss(logits_nchw, target_nhw, *, gamma=2, eps=1e-07,
               block_bytes=_TARGET_BLOCK_BYTES):
    """FocalLoss forward.

    logits_nchw: (N, C, H, W), f32 or bf16 (bf16 passes through; upcast in-kernel).
    target_nhw:  (N, H, W) int, 255 = ignore_index (int32 avoids a cast pass).
    """
    # TODO(synk): per-class CE `weight` (module default None) is not implemented.
    del eps  # stored by the torch module but unused in its forward pass
    N, C, H, W = logits_nchw.shape
    HW = H * W
    P = N * HW
    itemsize = jnp.dtype(logits_nchw.dtype).itemsize

    # ---- per-generation VMEM budget & C/dtype-aware tile sizing ---------------
    try:
        vmem_cap = int(pltpu.get_tpu_info().vmem_capacity_bytes)
    except Exception:
        vmem_cap = 64 * 1024 * 1024          # conservative fallback (v7x physical VMEM)
    vmem_budget = min(int(vmem_cap * 0.7), 96 * 1024 * 1024)

    # Double-buffered logits/target/out blocks + the large f32 intermediates
    # (upcast logits, shifted, exp_shifted, iota/select temps) per pixel.
    bytes_per_pixel = 2 * C * itemsize + 16 + (6 * C + 12) * 4
    max_pixels = max(128, vmem_budget // bytes_per_pixel)
    want_pixels = max(128, block_bytes // max(1, C * itemsize))
    tile_pixels = max(128, min(want_pixels, max_pixels))

    # Free reshapes of the native NCHW layout (no transpose, no extra HBM pass).
    logits = logits_nchw.reshape(N, C, HW)
    target = target_nhw.reshape(N, 1, HW)
    if target.dtype != jnp.int32:
        target = target.astype(jnp.int32)    # no-op when already int32

    fourd = (HW % 128 == 0)
    if fourd:
        # Sublane+lane-dense layout: pixels fill the full (8,128) vreg; C is the
        # leading (untiled) dim so channel reductions are plain VALU ops.
        S = HW // 128
        tile_s0 = max(1, tile_pixels // 128)
        if tile_s0 >= S:
            tile_s = S
        else:
            nb = _cdiv(S, max(8, _round_down(tile_s0, 8)))
            tile_s = min(S, _round_up(_cdiv(S, nb), 8))   # balanced, multiple of 8
        block_pixels = tile_s * 128
        total_blocks = _cdiv(S, tile_s)
        logits = logits.reshape(N, C, S, 128)
        target = target.reshape(N, 1, S, 128)
    else:
        # Lane-dense fallback for arbitrary H*W; no pad of the big logits array.
        if HW >= 128:
            t0 = min(max(128, _round_down(tile_pixels, 128)), _round_down(HW, 128))
            nb = _cdiv(HW, t0)
            tile_p = min(_round_down(HW, 128), _round_up(_cdiv(HW, nb), 128))
        else:
            # Tiny spatial extent: pad up to one 128-lane block (negligible copy).
            tile_p = 128
            pad = 128 - HW
            logits = jnp.pad(logits, ((0, 0), (0, 0), (0, pad)))
            target = jnp.pad(target, ((0, 0), (0, 0), (0, pad)),
                             constant_values=IGNORE_INDEX)
        block_pixels = tile_p
        total_blocks = _cdiv(HW, tile_p)

    # 2-way spatial split ("parallel") so both v7x TensorCores have work even at
    # N = 1; harmless on single-TC chips.  If the split does not divide evenly,
    # the overflow step re-reads the last block (clamped index_map) and is fully
    # masked in-kernel, contributing exactly zero.
    n_splits = 2 if total_blocks >= 2 else 1
    bps = _cdiv(total_blocks, n_splits)
    covered = n_splits * bps
    if covered == total_blocks:
        def sblk(c, s):
            return c * bps + s
    else:
        def sblk(c, s):
            return jnp.minimum(c * bps + s, total_blocks - 1)
    needs_mask = (HW % block_pixels != 0) or (covered != total_blocks)

    if fourd:
        in_specs = [
            pl.BlockSpec((None, C, tile_s, 128), lambda c, n, s: (n, 0, sblk(c, s), 0)),
            pl.BlockSpec((None, 1, tile_s, 128), lambda c, n, s: (n, 0, sblk(c, s), 0)),
        ]
        out_spec = pl.BlockSpec((None, None, 1, tile_s, 128),
                                lambda c, n, s: (c, n, 0, 0, 0))
        out_shape = jax.ShapeDtypeStruct((n_splits, N, 1, tile_s, 128), jnp.float32)
    else:
        in_specs = [
            pl.BlockSpec((None, C, tile_p), lambda c, n, s: (n, 0, sblk(c, s))),
            pl.BlockSpec((None, 1, tile_p), lambda c, n, s: (n, 0, sblk(c, s))),
        ]
        out_spec = pl.BlockSpec((None, None, 1, tile_p),
                                lambda c, n, s: (c, n, 0, 0))
        out_shape = jax.ShapeDtypeStruct((n_splits, N, 1, tile_p), jnp.float32)

    kernel = functools.partial(
        _focal_kernel, gamma=gamma, hw=HW, block_pixels=block_pixels,
        blocks_per_split=bps, needs_mask=needs_mask)

    cost = pl.CostEstimate(
        flops=int(P * (5 * C + 12)),
        transcendentals=int(P * (C + 2)),           # C exps + exp(-nll) + log
        bytes_accessed=int(N * C * HW * itemsize + P * 4
                           + n_splits * N * block_pixels * 4),
    )

    partial_sums = pl.pallas_call(
        kernel,
        out_shape=out_shape,
        grid_spec=pltpu.PrefetchScalarGridSpec(
            num_scalar_prefetch=0,
            grid=(n_splits, N, bps),
            in_specs=in_specs,
            out_specs=out_spec,
        ),
        compiler_params=pltpu.CompilerParams(
            dimension_semantics=("parallel", "parallel", "arbitrary"),
            vmem_limit_bytes=int(vmem_budget),
        ),
        cost_estimate=cost,
    )(logits, target)

    # reduction='none' + .mean(): ignored (255) positions contribute 0 to the
    # numerator but ARE counted in the denominator (mean over all N*H*W).
    return (jnp.sum(partial_sums) / jnp.float32(P)).astype(jnp.float32)


def _focal_loss_ref(logits_nchw, target_nhw, gamma=2):
    """Pure-JAX reference mirroring the PyTorch module."""
    N, C, H, W = logits_nchw.shape
    x = jnp.transpose(logits_nchw, (0, 2, 3, 1)).reshape(-1, C).astype(jnp.float32)
    t = target_nhw.reshape(-1).astype(jnp.int32)
    logz = jax.nn.logsumexp(x, axis=-1)
    safe_t = jnp.where(t == IGNORE_INDEX, 0, t)
    logit_t = jnp.take_along_axis(x, safe_t[:, None], axis=-1)[:, 0]
    nll = logz - logit_t
    nll = jnp.where(t == IGNORE_INDEX, 0.0, nll)
    p = jnp.exp(-nll)
    loss = (1.0 - p) ** gamma * nll
    return jnp.mean(loss)


if __name__ == "__main__":
    key = jax.random.PRNGKey(0)
    k1, k2, k3, k4, k5, k6, k7, k8 = jax.random.split(key, 8)

    # Case 1: H*W divisible by 128 -> sublane+lane-dense path, single block.
    N, C, H, W = 2, 4, 16, 16
    logits = jax.random.normal(k1, (N, C, H, W), dtype=jnp.float32)
    target = jax.random.randint(k2, (N, H, W), 0, C, dtype=jnp.int32)
    target = target.at[0, 0, :4].set(IGNORE_INDEX)
    target = target.at[1, 5, 7].set(IGNORE_INDEX)
    out = jax.block_until_ready(focal_loss(logits, target, gamma=2))
    ref = _focal_loss_ref(logits, target, gamma=2)
    assert jnp.allclose(out, ref, atol=1e-5, rtol=1e-5), (out, ref)

    # Case 2: tiny ragged spatial size (H*W < 128) -> lane-only fallback + mask.
    logits2 = jax.random.normal(k3, (1, 4, 5, 7), dtype=jnp.float32)
    target2 = jax.random.randint(k4, (1, 5, 7), 0, 4, dtype=jnp.int32)
    target2 = target2.at[0, 0, 0].set(IGNORE_INDEX)
    out2 = jax.block_until_ready(focal_loss(logits2, target2, gamma=2))
    ref2 = _focal_loss_ref(logits2, target2, gamma=2)
    assert jnp.allclose(out2, ref2, atol=1e-5, rtol=1e-5), (out2, ref2)

    # Case 3: ragged H*W >= 128 (overhanging last block, no pad) + 2-way split.
    logits3 = jax.random.normal(k5, (1, 4, 10, 13), dtype=jnp.float32)
    target3 = jax.random.randint(k6, (1, 10, 13), 0, 4, dtype=jnp.int32)
    target3 = target3.at[0, 2, :3].set(IGNORE_INDEX)
    out3 = jax.block_until_ready(focal_loss(logits3, target3, gamma=2))
    ref3 = _focal_loss_ref(logits3, target3, gamma=2)
    assert jnp.allclose(out3, ref3, atol=1e-5, rtol=1e-5), (out3, ref3)

    # Case 4: multiple spatial blocks, uneven 2-way split (clamped duplicate
    # block) and ragged last block on the 4-D path (small block_bytes to force it).
    logits4 = jax.random.normal(k7, (1, 4, 48, 48), dtype=jnp.float32)
    target4 = jax.random.randint(k8, (1, 48, 48), 0, 4, dtype=jnp.int32)
    target4 = target4.at[0, 3, :9].set(IGNORE_INDEX)
    out4 = jax.block_until_ready(
        focal_loss(logits4, target4, gamma=2, block_bytes=8192))
    ref4 = _focal_loss_ref(logits4, target4, gamma=2)
    assert jnp.allclose(out4, ref4, atol=1e-5, rtol=1e-5), (out4, ref4)

    print("KERNEL_OK")
</pallas_src>

<mosaic_0001>
module attributes {stable_mosaic.version = 11 : i64} {
  func.func @_focal_kernel(%arg0: i32, %arg1: i32, %arg2: i32, %arg3: memref<1x4x2x128xf32, #tpu.memory_space<vmem>>, %arg4: memref<1x1x2x128xi32, #tpu.memory_space<vmem>>, %arg5: memref<1x1x1x2x128xf32, #tpu.memory_space<vmem>>) attributes {dimension_semantics = [#tpu.dimension_semantics<parallel>, #tpu.dimension_semantics<parallel>, #tpu.dimension_semantics<arbitrary>], iteration_bounds = array<i64: 1, 2, 1>, scalar_prefetch = 0 : i64, scratch_operands = 0 : i64, tpu.core_type = #tpu.core_type<tc>, window_params = [{transform_indices = @transform_0, window_bounds = array<i64: 1, 4, 2, 128>}, {transform_indices = @transform_1, window_bounds = array<i64: 1, 1, 2, 128>}, {transform_indices = @transform_2, window_bounds = array<i64: 1, 1, 1, 2, 128>}]} {
    %c0_i32 = arith.constant 0 : i32
    %0 = arith.cmpi eq, %arg2, %c0_i32 : i32
    %1 = arith.extui %0 : i1 to i32
    %c0_i32_0 = arith.constant 0 : i32
    %2 = arith.cmpi ne, %1, %c0_i32_0 : i32
    scf.if %2 {
      %cst_25 = arith.constant 0.000000e+00 : f32
      %42 = vector.broadcast %cst_25 : f32 to vector<1x2x128xf32>
      %c0_26 = arith.constant 0 : index
      %c0_27 = arith.constant 0 : index
      %c0_28 = arith.constant 0 : index
      %c0_29 = arith.constant 0 : index
      %c0_30 = arith.constant 0 : index
      %43 = vector.load %arg5[%c0_26, %c0_27, %c0_28, %c0_29, %c0_30] : memref<1x1x1x2x128xf32, #tpu.memory_space<vmem>>, vector<1x1x1x2x128xf32>
      %44 = vector.shape_cast %43 : vector<1x1x1x2x128xf32> to vector<1x2x128xf32>
      %45 = vector.shape_cast %42 : vector<1x2x128xf32> to vector<1x1x1x2x128xf32>
      tpu.vector_store %arg5[%c0_26, %c0_27, %c0_28, %c0_29, %c0_30], %45 {strides = array<i32>} : memref<1x1x1x2x128xf32, #tpu.memory_space<vmem>>, vector<1x1x1x2x128xf32>,
    } else {
    }
    %c0 = arith.constant 0 : index
    %c0_1 = arith.constant 0 : index
    %c0_2 = arith.constant 0 : index
    %c0_3 = arith.constant 0 : index
    %3 = vector.load %arg3[%c0, %c0_1, %c0_2, %c0_3] : memref<1x4x2x128xf32, #tpu.memory_space<vmem>>, vector<1x4x2x128xf32>
    %4 = vector.shape_cast %3 : vector<1x4x2x128xf32> to vector<4x2x128xf32>
    %c0_4 = arith.constant 0 : index
    %c0_5 = arith.constant 0 : index
    %c0_6 = arith.constant 0 : index
    %c0_7 = arith.constant 0 : index
    %5 = vector.load %arg4[%c0_4, %c0_5, %c0_6, %c0_7] : memref<1x1x2x128xi32, #tpu.memory_space<vmem>>, vector<1x1x2x128xi32>
    %6 = vector.shape_cast %5 : vector<1x1x2x128xi32> to vector<1x2x128xi32>
    %cst = arith.constant dense<0xFF800000> : vector<2x128xf32>
    %7 = vector.multi_reduction <maximumf>, %4, %cst [0] : vector<4x2x128xf32> to vector<2x128xf32>
    %8 = vector.shape_cast %7 : vector<2x128xf32> to vector<1x2x128xf32>
    %9 = vector.broadcast %8 : vector<1x2x128xf32> to vector<4x2x128xf32>
    %10 = arith.subf %4, %9 : vector<4x2x128xf32>
    %11 = math.exp %10 : vector<4x2x128xf32>
    %cst_8 = arith.constant dense<0.000000e+00> : vector<2x128xf32>
    %12 = vector.multi_reduction <add>, %11, %cst_8 [0] : vector<4x2x128xf32> to vector<2x128xf32>
    %13 = vector.shape_cast %12 : vector<2x128xf32> to vector<1x2x128xf32>
    %14 = math.log %13 : vector<1x2x128xf32>
    %15 = tpu.iota {dimensions = array<i32: 0>} : vector<4x2x128xi32>
    %16 = vector.broadcast %6 : vector<1x2x128xi32> to vector<4x2x128xi32>
    %17 = arith.cmpi eq, %15, %16 : vector<4x2x128xi32>
    %cst_9 = arith.constant 0.000000e+00 : f32
    %18 = vector.broadcast %cst_9 : f32 to vector<4x2x128xf32>
    %19 = arith.select %17, %10, %18 : vector<4x2x128xi1>, vector<4x2x128xf32>
    %cst_10 = arith.constant dense<0.000000e+00> : vector<2x128xf32>
    %20 = vector.multi_reduction <add>, %19, %cst_10 [0] : vector<4x2x128xf32> to vector<2x128xf32>
    %21 = vector.shape_cast %20 : vector<2x128xf32> to vector<1x2x128xf32>
    %22 = arith.subf %14, %21 : vector<1x2x128xf32>
    %c255_i32 = arith.constant 255 : i32
    %23 = vector.broadcast %c255_i32 : i32 to vector<1x2x128xi32>
    %24 = arith.cmpi ne, %6, %23 : vector<1x2x128xi32>
    %cst_11 = arith.constant 0.000000e+00 : f32
    %25 = vector.broadcast %cst_11 : f32 to vector<1x2x128xf32>
    %26 = arith.select %24, %22, %25 : vector<1x2x128xi1>, vector<1x2x128xf32>
    %cst_12 = arith.constant 0.000000e+00 : f32
    %27 = vector.broadcast %cst_12 : f32 to vector<1x2x128xf32>
    %28 = arith.subf %27, %26 : vector<1x2x128xf32>
    %29 = math.exp %28 : vector<1x2x128xf32>
    %cst_13 = arith.constant 1.000000e+00 : f32
    %30 = vector.broadcast %cst_13 : f32 to vector<1x2x128xf32>
    %31 = arith.subf %30, %29 : vector<1x2x128xf32>
    %cst_14 = arith.constant 0.000000e+00 : f32
    %32 = vector.broadcast %cst_14 : f32 to vector<1x2x128xf32>
    %33 = arith.maximumf %31, %32 : vector<1x2x128xf32>
    %34 = arith.mulf %33, %33 : vector<1x2x128xf32>
    %c0_15 = arith.constant 0 : index
    %c0_16 = arith.constant 0 : index
    %c0_17 = arith.constant 0 : index
    %c0_18 = arith.constant 0 : index
    %c0_19 = arith.constant 0 : index
    %35 = vector.load %arg5[%c0_15, %c0_16, %c0_17, %c0_18, %c0_19] : memref<1x1x1x2x128xf32, #tpu.memory_space<vmem>>, vector<1x1x1x2x128xf32>
    %36 = vector.shape_cast %35 : vector<1x1x1x2x128xf32> to vector<1x2x128xf32>
    %37 = arith.mulf %34, %26 : vector<1x2x128xf32>
    %38 = arith.addf %36, %37 : vector<1x2x128xf32>
    %c0_20 = arith.constant 0 : index
    %c0_21 = arith.constant 0 : index
    %c0_22 = arith.constant 0 : index
    %c0_23 = arith.constant 0 : index
    %c0_24 = arith.constant 0 : index
    %39 = vector.load %arg5[%c0_20, %c0_21, %c0_22, %c0_23, %c0_24] : memref<1x1x1x2x128xf32, #tpu.memory_space<vmem>>, vector<1x1x1x2x128xf32>
    %40 = vector.shape_cast %39 : vector<1x1x1x2x128xf32> to vector<1x2x128xf32>
    %41 = vector.shape_cast %38 : vector<1x2x128xf32> to vector<1x1x1x2x128xf32>
    tpu.vector_store %arg5[%c0_20, %c0_21, %c0_22, %c0_23, %c0_24], %41 {strides = array<i32>} : memref<1x1x1x2x128xf32, #tpu.memory_space<vmem>>, vector<1x1x1x2x128xf32>,
    return
  }
  func.func @transform_0(%arg0: i32, %arg1: i32, %arg2: i32) -> (i32, i32, i32, i32) {
    %c1_i32 = arith.constant 1 : i32
    %0 = arith.muli %arg0, %c1_i32 : i32
    %1 = arith.addi %0, %arg2 : i32
    %c0_i32 = arith.constant 0 : i32
    %c0_i32_0 = arith.constant 0 : i32
    %c0_i32_1 = arith.constant 0 : i32
    return %arg1, %c0_i32, %1, %c0_i32_0 : i32, i32, i32, i32
  }
  func.func @transform_1(%arg0: i32, %arg1: i32, %arg2: i32) -> (i32, i32, i32, i32) {
    %c1_i32 = arith.constant 1 : i32
    %0 = arith.muli %arg0, %c1_i32 : i32
    %1 = arith.addi %0, %arg2 : i32
    %c0_i32 = arith.constant 0 : i32
    %c0_i32_0 = arith.constant 0 : i32
    %c0_i32_1 = arith.constant 0 : i32
    return %arg1, %c0_i32, %1, %c0_i32_0 : i32, i32, i32, i32
  }
  func.func @transform_2(%arg0: i32, %arg1: i32, %arg2: i32) -> (i32, i32, i32, i32, i32) {
    %c0_i32 = arith.constant 0 : i32
    %c0_i32_0 = arith.constant 0 : i32
    %c0_i32_1 = arith.constant 0 : i32
    %c0_i32_2 = arith.constant 0 : i32
    return %arg0, %arg1, %c0_i32, %c0_i32_0, %c0_i32_1 : i32, i32, i32, i32, i32
  }
}

</mosaic_0001>

<bundles_post_ra>
// kernel: tpu_custom_call.1
= control target key start
LH: loop header
LB: loop body
LE: loop exit
PB: predicated region body
PF: predicated region fallthrough
CT: control target
= control target key end

     0   :  { %7 = vsyncpa [#allocation3], 0  ;;  %s874_s0 = inlined_call_operand.hbm [shape: f32[2,4,2,128], index: 0, kind: input, shape index: {}]   ;;  %s875_s1 = inlined_call_operand.hbm [shape: s32[2,1,2,128], index: 1, kind: input, shape index: {}]   ;;  %s876_s2 = inlined_call_operand.hbm [shape: f32[1,2,1,2,128], index: 2, kind: output, shape index: {}]  }
   0x1   :  { %9 = vsyncpa [#allocation3 + $0x1], 0 }
   0x2   :  { %10 = vsyncpa [#allocation6], 0 }
   0x3   :  { %12 = vsyncpa [#allocation6 + $0x1], 0 }
   0x4   :  { %13 = vsyncpa [#allocation4], 0 }
   0x5   :  { %15 = vsyncpa [#allocation4 + $0x1], 0  ;;  %s691_s9 = smov 0   ;;  %s693_s10 = smov 0  }
   0x6   :  { %s695_s11 = smov 0   ;;  %s697_s12 = smov 0  }
   0x7   :  { %s699_s13 = smov 0   ;;  %s701_s14 = smov 0  }
   0x8 LB: > { %s428_s15 = sadd.s32 4294967295, %s668_s14   ;;  %s429_s16 = sadd.s32 4294967294, %s668_s14   ;;  %s668_s14 = sphi %s701_s14, %s21_s14   ;;  %s664_s13 = sphi %s699_s13, %s888_s13   ;;  %s660_s12 = sphi %s697_s12, %s887_s12   ;;  %s656_s11 = sphi %s695_s11, %s886_s11   ;;  %s652_s10 = sphi %s693_s10, %s885_s10   ;;  %s648_s9 = sphi %s691_s9, %s884_s9  }
   0x9   : > { %s36_s17 = sadd.s32 1, %s664_s13  ;;  %s51_s18 = sadd.s32 1, %s656_s11 }
   0xa   : > { %p38_p0 = scmp.ge.s32.totalorder %s36_s17, 2  ;;  %p58_p1 = scmp.ne.s32.totalorder %s656_s11, %s652_s10 }
   0xb   : > { %p59_p2 = scmp.eq.s32.totalorder %s668_s14, 0  ;;  %p64_p3 = scmp.ne.s32.totalorder %s652_s10, %s648_s9 }
   0xc   : > { %s890_s17 = smov (%p38_p0, %s36_s17), 0  ;;  %p65_p5 = scmp.eq.s32.totalorder %s428_s15, 0 }
   0xd   : > { %p732_p4 = por %p59_p2, %p58_p1  ;;  %s46_s20 = ssub.s32 %s664_s13, %s890_s17 }
   0xe   : > { %p120_p6 = scmp.eq.s32.totalorder %s428_s15, 1  ;;  %p49_p7 = scmp.eq.s32.totalorder %s46_s20, 0 }
   0xf   : > { %p738_p8 = por %p65_p5, %p64_p3  ;;  %p126_p10 = scmp.eq.s32.totalorder %s429_s16, 1 }
  0x10   : > { %p742_p9 = por %p120_p6, %p58_p1  ;;  %p463_p13 = scmp.lt.s32.totalorder %s668_s14, 2 }
  0x11   : > { %s747_s23 = scalar_select %p49_p7, %s656_s11, %s51_s18  }
  0x12   : > { %p749_p11 = por %p126_p10, %p64_p3  ;;  %s756_s25 = sand.u32 1, %s656_s11  }
  0x13   : > { %s432_s26 = sshll.u32 %s756_s25, 3  ;;  %s445_s27 = sshll.u32 %s664_s13, 7 }
  0x14   : > { %s158_s30 = scalar_lea.hbm %s874_s0, %s445_s27  ;;  %s150_s3 = scalar_lea.vmem [#allocation2], %s432_s26 }
  0x15   : > { %s159_s4 = sshll.u32 %s150_s3, 4  ;;  %p765_p0 = pnand %p463_p13, %p732_p4  ;;  %s160_s4 = int_to_ptr.vmem [resolvable:$true] %s159_s4 }
  0x16   : > { %p437_p1 = scmp.ge.s32.totalorder %s668_s14, 1  ;;  %s147_s6 = scalar_lea.sflag [#allocation3], %s756_s25 }
  0x17   : > { %p530_p2 = pneg %p765_p0  ;;  %s541_s7 = scalar_lea.vmem %s160_s4, 128 }
  0x18   : > { %p542_p3 = scmp.ne.s32.totalorder %s160_s4, %s541_s7  ;;  %s670_s8 = smov [#allocation2]  }
  0x19   : > { %s546_s15 = sshll.u32 %s670_s8, 4  ;;  %s547_s15 = int_to_ptr.vmem [resolvable:$false] %s546_s15 }
  0x1a   : > { %p544_p5 = pnand %p542_p3, %p530_p2  ;;  %s548_s16 = scalar_lea.vmem %s547_s15, 256 }
  0x1b   : > { %p549_p4 = scmp.lt.s32.totalorder %s160_s4, %s547_s15  ;;  %p550_p7 = scmp.lt.s32.totalorder %s548_s16, %s541_s7 }
  0x1c   : > { %p545_p6 = pneg %p544_p5 }
  0x1d   : > { %p551_p10 = por %p550_p7, %p549_p4 }
  0x1f   : > { %p552_p13 = pnand %p551_p10, %p545_p6 }
  0x21   : > { %555 = shalt.err (!%p552_p13)
}
  0x22   : > { %s671_s18 = smov 32   ;;  %s672_s19 = smov 2  }
  0x23   : > { %455 = dma.hbm_to_vmem [thread:$0]  (!%p765_p0), %s158_s30, 128, %s160_s4, %s147_s6, %s671_s18, %s671_s18, %s672_s19  }
  0x24   : > { %p187_p3 = scmp.lt.s32.totalorder %s668_s14, 3  ;;  %s435_s20 = sshll.u32 %s756_s25, 1 }
  0x25   : > { %s436_s26 = sshll.u32 %s664_s13, 5  ;;  %s173_s7 = scalar_lea.vmem [#allocation5], %s435_s20 }
  0x26   : > { %p783_p5 = pnand %p437_p1, %p187_p3  ;;  %s180_s3 = scalar_lea.hbm %s875_s1, %s436_s26 }
  0x27   : > { %s182_s8 = sshll.u32 %s173_s7, 4  ;;  %s170_s15 = scalar_lea.sflag [#allocation6], %s756_s25  ;;  %s183_s8 = int_to_ptr.vmem [resolvable:$true] %s182_s8 }
  0x28   : > { %s569_s16 = scalar_lea.vmem %s183_s8, 32  ;;  %s673_s30 = smov [#allocation5]  }
  0x29   : > { %p570_p6 = scmp.ne.s32.totalorder %s183_s8, %s569_s16  ;;  %s574_s4 = sshll.u32 %s673_s30, 4  ;;  %s575_s4 = int_to_ptr.vmem [resolvable:$false] %s574_s4 }
  0x2a   : > { %s576_s6 = scalar_lea.vmem %s575_s4, 64  ;;  %p577_p1 = scmp.lt.s32.totalorder %s183_s8, %s575_s4 }
  0x2b   : > { %p572_p4 = pnand %p570_p6, %p530_p2  ;;  %p578_p10 = scmp.lt.s32.totalorder %s576_s6, %s569_s16 }
  0x2d   : > { %p573_p7 = pneg %p572_p4  ;;  %p579_p13 = por %p578_p10, %p577_p1 }
  0x2f   : > { %p580_p3 = pnand %p579_p13, %p573_p7 }
  0x31   : > { %583 = shalt.err (!%p580_p3)
}
  0x32   : > { %458 = dma.hbm_to_vmem [thread:$0]  (!%p765_p0), %s180_s3, 32, %s183_s8, %s170_s15  }
  0x33   : > { %191 = sbr.rel (%p783_p5) target bundleno = 154 (0x9a), region = 28  ;;  %s799_s25 = sand.u32 (!%p783_p5), 1, %s652_s10  }
  0x34   : > { %s438_s18 = sshll.u32 (!%p783_p5), %s799_s25, 3  ;;  %s194_s19 = scalar_lea.sflag (!%p783_p5), [#allocation3], %s799_s25 }
  0x35   : > { %s197_s20 = scalar_lea.vmem (!%p783_p5), [#allocation2], %s438_s18 }
  0x38   : > { %635 = dma.done.wait (%p738_p8), %s194_s19, 128  }
  0x39   : > { %637 = vsyncadd (%p738_p8), %s194_s19, 4294967168  ;;  %s439_s5 = sshll.u32 %s799_s25, 1  ;;  %s203_s26 = scalar_lea.sflag [#allocation6], %s799_s25 }
  0x3a   : > { %s809_s27 = scalar_lea.vmem [#allocation5], %s439_s5 }
  0x3b   : > { %639 = dma.done.wait (%p738_p8), %s203_s26, 32  }
  0x3c   : > { %641 = vsyncadd (%p738_p8), %s203_s26, 4294967264  ;;  %s815_s28 = scalar_lea.vmem [#allocation7], %s439_s5  ;;  %v674_v0 = vmov 0.0   ;;  %vm244_vm0 = vcmask 1041408   ;;  %v239_v1 = vld [vmem:[%s197_s20] sm:$0x3] }
  0x3d   : > { %238 = vst [vmem:[%s815_s28] sm:$0x3] %v674_v0  ;;  %v240_v2 = vld [vmem:[%s197_s20 + $0x2] sm:$0x3]  ;;  %v241_v3 = vld [vmem:[%s197_s20 + $0x4] sm:$0x3]  ;;  %v245_v5 = vsel %vm244_vm0, %v239_v1, -inf }
  0x3e   : > { %v242_v4 = vld [vmem:[%s197_s20 + $0x6] sm:$0x3]  ;;  %v246_v6 = vsel %vm244_vm0, %v240_v2, -inf  ;;  %v247_v7 = vsel %vm244_vm0, %v241_v3, -inf  ;;  %v243_v22 = vld [vmem:[%s809_s27] sm:$0x3] }
  0x3f   : > { %v248_v8 = vsel %vm244_vm0, %v242_v4, -inf  ;;  %v249_v9 = vmax.f32 %v245_v5, %v246_v6  ;;  %vm273_vm1 = vcmp.eq.s32.totalorder %v243_v22, 0  ;;  %vm274_vm2 = vcmp.eq.s32.totalorder %v243_v22, 1  ;;  %s442_s21 = sshll.u32 %s660_s12, 5  ;;  %s317_s29 = sshll.u32 %s815_s28, 4  ;;  %s318_s29 = int_to_ptr.vmem [resolvable:$true] %s317_s29 }
  0x40   : > { %v250_v10 = vmax.f32 %v247_v7, %v248_v8  ;;  %vm275_vm3 = vcmp.eq.s32.totalorder %v243_v22, 2  ;;  %vm276_vm4 = vcmp.eq.s32.totalorder %v243_v22, 3  ;;  %vm289_vm5 = vcmp.ne.s32.totalorder %v243_v22, 255  ;;  %s315_s8 = scalar_lea.hbm %s876_s2, %s442_s21  ;;  %s302_s15 = scalar_lea.sflag [#allocation4], %s799_s25 }
  0x41   : > { %s584_s16 = scalar_lea.vmem %s318_s29, 32  ;;  %s675_s30 = smov [#allocation7]  }
  0x42   : > { %v251_v11 = vmax.f32 %v249_v9, %v250_v10  ;;  %p585_p8 = scmp.ne.s32.totalorder %s318_s29, %s584_s16  ;;  %s588_s4 = sshll.u32 %s675_s30, 4  ;;  %s589_s4 = int_to_ptr.vmem [resolvable:$false] %s588_s4 }
  0x43   : > { %s590_s6 = scalar_lea.vmem %s589_s4, 64  ;;  %p591_p5 = scmp.lt.s32.totalorder %s318_s29, %s589_s4 }
  0x44   : > { %v252_v12 = vsub.f32 %v239_v1, %v251_v11  ;;  %v253_v13 = vsub.f32 %v240_v2, %v251_v11  ;;  %v254_v14 = vsub.f32 %v241_v3, %v251_v11  ;;  %v255_v15 = vsub.f32 %v242_v4, %v251_v11  ;;  %v297_v53 = vld [vmem:[%s815_s28] sm:$0x3]  ;;  %p586_p0 = pnand %p585_p8, %p742_p9  ;;  %p592_p6 = scmp.lt.s32.totalorder %s590_s6, %s584_s16 }
  0x46   : > { %v256_v16 = vmul.f32 1.442695, %v252_v12  ;;  %v258_v17 = vmul.f32 1.442695, %v253_v13  ;;  %v260_v18 = vmul.f32 1.442695, %v254_v14  ;;  %p587_p2 = pneg %p586_p0  ;;  %p593_p4 = por %p592_p6, %p591_p5 }
  0x47   : > { %v262_v19 = vmul.f32 1.442695, %v255_v15  ;;  %v277_v32 = vsel %vm273_vm1, %v252_v12, 0.0  ;;  %v278_v33 = vsel %vm274_vm2, %v253_v13, 0.0  ;;  %v279_v36 = vsel %vm275_vm3, %v254_v14, 0.0 }
  0x48   : > { %516 = vpow2.f32 %v256_v16  ;;  %v281_v34 = vsel %vm244_vm0, %v277_v32, 0.0  ;;  %v282_v35 = vsel %vm244_vm0, %v278_v33, 0.0  ;;  %v284_v38 = vsel %vm244_vm0, %v279_v36, 0.0  ;;  %p594_p7 = pnand %p593_p4, %p587_p2 }
  0x49   : > { %518 = vpow2.f32 %v258_v17  ;;  %v283_v37 = vadd.f32 %v282_v35, %v281_v34  ;;  %v280_v39 = vsel %vm276_vm4, %v255_v15, 0.0 }
  0x4a   : > { %520 = vpow2.f32 %v260_v18  ;;  %v286_v41 = vsel %vm244_vm0, %v280_v39, 0.0 }
  0x4b   : > { %522 = vpow2.f32 %v262_v19  ;;  %v285_v40 = vadd.f32 %v284_v38, %v283_v37 }
  0x4d   : > { %v287_v42 = vadd.f32 %v286_v41, %v285_v40 }
  0x55   : > { %v517_v20 = vpop.eup %516 }
  0x56   : > { %v519_v21 = vpop.eup %518  ;;  %v264_v23 = vsel %vm244_vm0, %v517_v20, 0.0 }
  0x57   : > { %v521_v24 = vpop.eup %520  ;;  %v265_v25 = vsel %vm244_vm0, %v519_v21, 0.0 }
  0x58   : > { %v523_v26 = vpop.eup %522  ;;  %v266_v27 = vadd.f32 %v265_v25, %v264_v23  ;;  %v267_v28 = vsel %vm244_vm0, %v521_v24, 0.0 }
  0x59   : > { %v269_v29 = vsel %vm244_vm0, %v523_v26, 0.0 }
  0x5a   : > { %v268_v30 = vadd.f32 %v267_v28, %v266_v27 }
  0x5c   : > { %v270_v31 = vadd.f32 %v269_v29, %v268_v30 }
  0x5e   : > { %524 = vlog2.f32 %v270_v31 }
  0x6b   : > { %v525_v43 = vpop.eup %524 }
  0x6c   : > { %v272_v44 = vmul.f32 0.6931472, %v525_v43 }
  0x6e   : > { %v288_v45 = vsub.f32 %v272_v44, %v287_v42 }
  0x70   : > { %v290_v46 = vsel %vm289_vm5, %v288_v45, 0.0 }
  0x71   : > { %v291_v47 = vsub.f32 0.0, %v290_v46 }
  0x73   : > { %v292_v48 = vmul.f32 1.442695, %v291_v47 }
  0x75   : > { %526 = vpow2.f32 %v292_v48 }
  0x82   : > { %v527_v49 = vpop.eup %526 }
  0x83   : > { %v294_v50 = vsub.f32 1.0, %v527_v49 }
  0x85   : > { %v295_v51 = vmax.f32 %v294_v50, 0.0 }
  0x87   : > { %v296_v52 = vmul.f32 %v295_v51, %v295_v51 }
  0x89   : > { %v298_v54 = vmul.f32 %v296_v52, %v290_v46 }
  0x8b   : > { %v299_v55 = vadd.f32 %v298_v54, %v297_v53 }
  0x8d   : > { %300 = vst [vmem:[%s815_s28] sm:$0x3] %v299_v55 }
  0x8e   : > { %597 = shalt.err (!%p594_p7)
}
  0x8f   : > { %s598_s12 = scalar_lea.hbm %s315_s8, 32  ;;  %s602_s19 = scalar_lea.hbm %s876_s2, 64 }
  0x90   : > { %p599_p1 = scmp.ne.s32.totalorder %s315_s8, %s598_s12  ;;  %p603_p3 = scmp.lt.s32.totalorder %s315_s8, %s876_s2 }
  0x91   : > { %p604_p8 = scmp.lt.s32.totalorder %s602_s19, %s598_s12 }
  0x92   : > { %p600_p10 = pnand %p599_p1, %p742_p9 }
  0x93   : > { %p605_p0 = por %p604_p8, %p603_p3 }
  0x94   : > { %p601_p13 = pneg %p600_p10 }
  0x96   : > { %p606_p12 = pnand %p605_p0, %p601_p13 }
  0x98   : > { %609 = shalt.err (!%p606_p12)
}
  0x99   : > { %450 = dma.vmem_to_hbm [thread:$0]  (%p742_p9), %s318_s29, 32, %s315_s8, %s302_s15  }
  0x9a PF: > { %s329_s26 = sand.u32 1, %s648_s9   ;;  %p883_p2 = scmp.ge.s32.totalorder %s668_s14, 2 }
  0x9b   : > { %s330_s27 = scalar_lea.sflag [#allocation4], %s329_s26 }
  0x9c   : > { %p460_p5 = pnand %p883_p2, %p749_p11 }
  0x9e   : > { %p461_p6 = pneg %p460_p5 }
  0xa0   : > { %643 = dma.done.wait (%p461_p6), %s330_s27, 32  }
  0xa1   : > { %645 = vsyncadd (%p461_p6), %s330_s27, 4294967264  ;;  %s21_s14 = sadd.s32 1, %s668_s14   ;;  %s884_s9 = smov %s652_s10 }
  0xa2   : > { %p18_p4 = scmp.ge.s32.totalorder %s21_s14, 4   ;;  %s885_s10 = smov %s656_s11 }
  0xa3   : > { %s886_s11 = smov %s747_s23  ;;  %s887_s12 = smov %s664_s13 }
  0xa4   : > { %s888_s13 = smov %s890_s17  ;;  %20 = sbr.rel (!%p18_p4) target bundleno = 8 (0x8), region = 90 }
  0xa9   :  { %335 = vsyncpa [#allocation3], 1 }
  0xaa   :  { %337 = vsyncpa [#allocation3 + $0x1], 1 }
  0xab   :  { %338 = vsyncpa [#allocation6], 1 }
  0xac   :  { %340 = vsyncpa [#allocation6 + $0x1], 1 }
  0xad   :  { %341 = vsyncpa [#allocation4], 1 }
  0xae   :  { %343 = vsyncpa [#allocation4 + $0x1], 1 }

</bundles_post_ra>
